<compile_context>
chip_gen: v7x
topology: tpu7x:2x2x1
jax: 0.10.0
libtpu: 0.0.40
codegen_flags: <defaults>
</compile_context>

<pallas_src>
import jax
import jax.numpy as jnp
from jax.experimental import pallas as pl
from jax.experimental.pallas import tpu as pltpu

HIDDEN = 50
LANE = 128
PACK_COLS = 8              # packed small-parameter matrix: (HIDDEN, PACK_COLS)
DEFAULT_MAX_TILE = 16384   # max batch lanes per grid step (multiple of 128)
MIN_GRID_STEPS = 2         # >=2 steps so "parallel" can use both v7x TCs


def _round_up(x, m):
    return ((x + m - 1) // m) * m


def _d_kernel(x_ref, w2_ref, p_ref, o_ref):
    """Forward pass, batch-on-lanes layout.

    x:  (1, BT)       batch tile on the lane axis
    w2: (50, 50)      torch (out, in) layout, VMEM-resident across steps
    p:  (50, 8)       packed: col0=w1, col1=b1, col2=b2, col3=w3, col4=b3
    out: (1, BT)
    """
    x = x_ref[...]                           # (1, BT) f32
    p = p_ref[...]                           # (50, 8) f32
    w1 = p[:, 0:1]                           # (50, 1)
    b1 = p[:, 1:2]                           # (50, 1)
    b2 = p[:, 2:3]                           # (50, 1)
    w3 = p[:, 3:4]                           # (50, 1)
    b3 = p[0:1, 4:5]                         # (1, 1)

    # fc1: in_features == 1 -> broadcast outer product on the VPU.
    h1 = w1 * x + b1                         # (50, BT)
    h1 = jnp.maximum(h1, 0.01 * h1)          # leaky_relu(0.01), 2 VALU ops/elem

    # fc2: (50,50) @ (50,BT) on the MXU; bf16 operands, f32 accumulation.
    h2 = jnp.dot(w2_ref[...].astype(jnp.bfloat16),
                 h1.astype(jnp.bfloat16),
                 preferred_element_type=jnp.float32)     # (50, BT) f32
    h2 = h2 + b2
    h2 = jnp.maximum(h2, 0.01 * h2)          # leaky_relu(0.01)

    # fc3: single output feature -> VPU multiply + sublane reduce (skip MXU).
    h3 = jnp.sum(w3 * h2, axis=0, keepdims=True) + b3    # (1, BT)
    o_ref[...] = jax.nn.sigmoid(h3).astype(o_ref.dtype)


def _choose_tiling(batch, max_tile=DEFAULT_MAX_TILE, min_steps=MIN_GRID_STEPS):
    """Pick a lane tile (multiple of 128, <= max_tile) giving >= min_steps
    balanced grid steps when the batch is large enough."""
    lanes = _round_up(max(batch, 1), LANE)
    steps = max(min_steps, pl.cdiv(lanes, max_tile))
    bt = _round_up(pl.cdiv(lanes, steps), LANE)          # <= max_tile
    b_pad = _round_up(lanes, bt)
    return bt, b_pad


def d_forward(x, params, max_tile=DEFAULT_MAX_TILE):
    """Discriminator forward pass as a single tiled Pallas call.

    x: (B, 1) float32 (PyTorch convention) or (B,) (lane-major, avoids a
    wrapper-side relayout). Returns the same rank as the input.
    """
    w1, b1, w2, b2, w3, b3 = params
    orig_ndim = x.ndim
    xb = x.reshape(-1)
    B = xb.shape[0]

    bt, B_pad = _choose_tiling(B, max_tile)
    xt = jnp.pad(xb, (0, B_pad - B)).reshape(1, B_pad)

    # Pack the five tiny parameter tensors into one (HIDDEN, 8) array.
    packed = jnp.zeros((HIDDEN, PACK_COLS), jnp.float32)
    packed = packed.at[:, 0].set(w1.reshape(HIDDEN))
    packed = packed.at[:, 1].set(b1.reshape(HIDDEN))
    packed = packed.at[:, 2].set(b2.reshape(HIDDEN))
    packed = packed.at[:, 3].set(w3.reshape(HIDDEN))
    packed = packed.at[:, 4].set(b3.reshape(())[...])    # scalar -> whole column

    out = pl.pallas_call(
        _d_kernel,
        out_shape=jax.ShapeDtypeStruct((1, B_pad), jnp.float32),
        grid=(B_pad // bt,),
        in_specs=[
            pl.BlockSpec((1, bt), lambda i: (0, i)),              # x (lane-dense)
            pl.BlockSpec((HIDDEN, HIDDEN), lambda i: (0, 0)),     # w2, resident
            pl.BlockSpec((HIDDEN, PACK_COLS), lambda i: (0, 0)),  # packed params
        ],
        out_specs=pl.BlockSpec((1, bt), lambda i: (0, i)),
        compiler_params=pltpu.CompilerParams(
            dimension_semantics=("parallel",),
            vmem_limit_bytes=48 * 1024 * 1024,
        ),
    )(xt, w2, packed)

    out = out[0, :B]
    if orig_ndim == 2:
        out = out.reshape(B, 1)
    return out


def init_params(key):
    """Deterministic init matching nn.Linear(1,50)/(50,50)/(50,1), PyTorch
    (out, in) layout."""
    k1, k2, k3, k4, k5, k6 = jax.random.split(key, 6)

    def uniform(k, shape, fan_in):
        bound = 1.0 / jnp.sqrt(fan_in)
        return jax.random.uniform(k, shape, jnp.float32, -bound, bound)

    w1 = uniform(k1, (HIDDEN, 1), 1.0)
    b1 = uniform(k2, (HIDDEN,), 1.0)
    w2 = uniform(k3, (HIDDEN, HIDDEN), 50.0)
    b2 = uniform(k4, (HIDDEN,), 50.0)
    w3 = uniform(k5, (1, HIDDEN), 50.0)
    b3 = uniform(k6, (1,), 50.0)
    return (w1, b1, w2, b2, w3, b3)


def d_forward_ref(x, params):
    """Pure-JAX f32 reference (batch-major math) for correctness checking."""
    w1, b1, w2, b2, w3, b3 = params
    x2 = x.reshape(-1, 1)
    h1 = jax.nn.leaky_relu(x2 @ w1.T + b1, negative_slope=0.01)
    h2 = jax.nn.leaky_relu(h1 @ w2.T + b2, negative_slope=0.01)
    out = jax.nn.sigmoid(h2 @ w3.T + b3)
    return out if x.ndim == 2 else out.reshape(-1)


if __name__ == "__main__":
    key = jax.random.PRNGKey(0)
    kx, kp = jax.random.split(key)
    params = init_params(kp)

    # Small batch (ragged w.r.t. the 128-lane tile), PyTorch (B, 1) contract.
    # Tolerance is loosened because fc2 runs with bf16 MXU operands.
    B = 8
    x = jax.random.normal(kx, (B, 1), dtype=jnp.float32)
    out = jax.block_until_ready(d_forward(x, params))
    ref = d_forward_ref(x, params)
    assert out.shape == (B, 1), out.shape
    assert jnp.allclose(out, ref, atol=2e-2, rtol=2e-2), (out, ref)

    # Larger batch: exercises padding + the multi-step (>=2) batch grid.
    B2 = 5000
    x2 = jax.random.normal(kx, (B2, 1), dtype=jnp.float32)
    out2 = jax.block_until_ready(d_forward(x2, params))
    ref2 = d_forward_ref(x2, params)
    assert out2.shape == (B2, 1), out2.shape
    assert jnp.allclose(out2, ref2, atol=2e-2, rtol=2e-2)

    print("KERNEL_OK")
</pallas_src>

<mosaic_0001>
module attributes {stable_mosaic.version = 11 : i64} {
  func.func @_d_kernel(%arg0: i32, %arg1: memref<1x128xf32, #tpu.memory_space<vmem>>, %arg2: memref<50x50xf32, #tpu.memory_space<vmem>>, %arg3: memref<50x8xf32, #tpu.memory_space<vmem>>, %arg4: memref<1x128xf32, #tpu.memory_space<vmem>>) attributes {dimension_semantics = [#tpu.dimension_semantics<parallel>], iteration_bounds = array<i64: 1>, scalar_prefetch = 0 : i64, scratch_operands = 0 : i64, tpu.core_type = #tpu.core_type<tc>, window_params = [{transform_indices = @transform_0, window_bounds = array<i64: 1, 128>}, {pipeline_mode = #tpu.pipeline_mode<synchronous>, transform_indices = @transform_1, window_bounds = array<i64: 50, 50>}, {pipeline_mode = #tpu.pipeline_mode<synchronous>, transform_indices = @transform_2, window_bounds = array<i64: 50, 8>}, {transform_indices = @transform_3, window_bounds = array<i64: 1, 128>}]} {
    %c0 = arith.constant 0 : index
    %c0_0 = arith.constant 0 : index
    %0 = vector.load %arg1[%c0, %c0_0] : memref<1x128xf32, #tpu.memory_space<vmem>>, vector<1x128xf32>
    %c0_1 = arith.constant 0 : index
    %c0_2 = arith.constant 0 : index
    %1 = vector.load %arg3[%c0_1, %c0_2] : memref<50x8xf32, #tpu.memory_space<vmem>>, vector<50x8xf32>
    %2 = vector.extract_strided_slice %1 {offsets = [0, 0], sizes = [50, 1], strides = [1, 1]} : vector<50x8xf32> to vector<50x1xf32>
    %3 = vector.extract_strided_slice %1 {offsets = [0, 1], sizes = [50, 1], strides = [1, 1]} : vector<50x8xf32> to vector<50x1xf32>
    %4 = vector.extract_strided_slice %1 {offsets = [0, 2], sizes = [50, 1], strides = [1, 1]} : vector<50x8xf32> to vector<50x1xf32>
    %5 = vector.extract_strided_slice %1 {offsets = [0, 3], sizes = [50, 1], strides = [1, 1]} : vector<50x8xf32> to vector<50x1xf32>
    %6 = vector.extract_strided_slice %1 {offsets = [0, 4], sizes = [1, 1], strides = [1, 1]} : vector<50x8xf32> to vector<1x1xf32>
    %7 = vector.broadcast %2 : vector<50x1xf32> to vector<50x128xf32>
    %8 = vector.broadcast %0 : vector<1x128xf32> to vector<50x128xf32>
    %9 = arith.mulf %7, %8 : vector<50x128xf32>
    %10 = vector.broadcast %3 : vector<50x1xf32> to vector<50x128xf32>
    %11 = arith.addf %9, %10 : vector<50x128xf32>
    %cst = arith.constant 0.00999999977 : f32
    %12 = vector.broadcast %cst : f32 to vector<50x128xf32>
    %13 = arith.mulf %12, %11 : vector<50x128xf32>
    %14 = arith.maximumf %11, %13 : vector<50x128xf32>
    %c0_3 = arith.constant 0 : index
    %c0_4 = arith.constant 0 : index
    %15 = vector.load %arg2[%c0_3, %c0_4] : memref<50x50xf32, #tpu.memory_space<vmem>>, vector<50x50xf32>
    %16 = arith.truncf %15 : vector<50x50xf32> to vector<50x50xbf16>
    %17 = arith.truncf %14 : vector<50x128xf32> to vector<50x128xbf16>
    %cst_5 = arith.constant dense<0.000000e+00> : vector<50x128xf32>
    %18 = tpu.matmul %16, %17, %cst_5 {dimension_numbers = #tpu.dot_dimension_numbers<[1], [0], [0], [1], [0, 0, 1, 1], [], []>} : vector<50x50xbf16>, vector<50x128xbf16>, vector<50x128xf32> -> vector<50x128xf32>
    %19 = vector.broadcast %4 : vector<50x1xf32> to vector<50x128xf32>
    %20 = arith.addf %18, %19 : vector<50x128xf32>
    %cst_6 = arith.constant 0.00999999977 : f32
    %21 = vector.broadcast %cst_6 : f32 to vector<50x128xf32>
    %22 = arith.mulf %21, %20 : vector<50x128xf32>
    %23 = arith.maximumf %20, %22 : vector<50x128xf32>
    %24 = vector.broadcast %5 : vector<50x1xf32> to vector<50x128xf32>
    %25 = arith.mulf %24, %23 : vector<50x128xf32>
    %cst_7 = arith.constant dense<0.000000e+00> : vector<128xf32>
    %26 = vector.multi_reduction <add>, %25, %cst_7 [0] : vector<50x128xf32> to vector<128xf32>
    %27 = vector.shape_cast %26 : vector<128xf32> to vector<1x128xf32>
    %28 = vector.broadcast %6 : vector<1x1xf32> to vector<1x128xf32>
    %29 = arith.addf %27, %28 : vector<1x128xf32>
    %30 = arith.negf %29 : vector<1x128xf32>
    %31 = math.exp %30 : vector<1x128xf32>
    %cst_8 = arith.constant 1.000000e+00 : f32
    %32 = vector.broadcast %cst_8 : f32 to vector<1x128xf32>
    %33 = arith.addf %32, %31 : vector<1x128xf32>
    %34 = arith.divf %32, %33 : vector<1x128xf32>
    %c0_9 = arith.constant 0 : index
    %c0_10 = arith.constant 0 : index
    %35 = vector.load %arg4[%c0_9, %c0_10] : memref<1x128xf32, #tpu.memory_space<vmem>>, vector<1x128xf32>
    tpu.vector_store %arg4[%c0_9, %c0_10], %34 {strides = array<i32>} : memref<1x128xf32, #tpu.memory_space<vmem>>, vector<1x128xf32>,
    return
  }
  func.func @transform_0(%arg0: i32) -> (i32, i32) {
    %c0_i32 = arith.constant 0 : i32
    %c0_i32_0 = arith.constant 0 : i32
    return %c0_i32, %arg0 : i32, i32
  }
  func.func @transform_1(%arg0: i32) -> (i32, i32) {
    %c0_i32 = arith.constant 0 : i32
    %c0_i32_0 = arith.constant 0 : i32
    %c0_i32_1 = arith.constant 0 : i32
    return %c0_i32, %c0_i32_0 : i32, i32
  }
  func.func @transform_2(%arg0: i32) -> (i32, i32) {
    %c0_i32 = arith.constant 0 : i32
    %c0_i32_0 = arith.constant 0 : i32
    %c0_i32_1 = arith.constant 0 : i32
    return %c0_i32, %c0_i32_0 : i32, i32
  }
  func.func @transform_3(%arg0: i32) -> (i32, i32) {
    %c0_i32 = arith.constant 0 : i32
    %c0_i32_0 = arith.constant 0 : i32
    return %c0_i32, %arg0 : i32, i32
  }
}

</mosaic_0001>

<bundles_post_ra>
// kernel: tpu_custom_call.1
= control target key start
LH: loop header
LB: loop body
LE: loop exit
PB: predicated region body
PF: predicated region fallthrough
CT: control target
= control target key end

     0   :  { %v422_v2 = vmov 1   ;;  %s509_s0 = inlined_call_operand.vmem [shape: f32[1,128], index: 0, kind: input, shape index: {}]   ;;  %s510_s1 = inlined_call_operand.vmem [shape: f32[50,50], index: 1, kind: input, shape index: {}]   ;;  %s511_s2 = inlined_call_operand.vmem [shape: f32[50,8], index: 2, kind: input, shape index: {}]   ;;  %s512_s3 = inlined_call_operand.hbm [shape: f32[1,128], index: 3, kind: output, shape index: {}]  }
   0x1   :  { %v19_v0 = vld [vmem:[%s511_s2 + $0x10] sm:$0xff]  ;;  %v17_v1 = vld [vmem:[%s511_s2] sm:$0xff]  ;;  %382 = vset.pattern.permute.xlu0 %v422_v2  ;;  %380 = vset.pattern.permute.xlu1 %v422_v2 }
   0x2   :  { %81 = vperm.xlu0 %382, %v19_v0   ;;  %73 = vperm.xlu1 %380, %v17_v1  }
   0x3   :  { %8 = vsyncpa [#allocation3], 0  ;;  %v18_v3 = vld [vmem:[%s511_s2 + $0x8] sm:$0xff]  ;;  %v423_v4 = vmov 0   ;;  %v20_v5 = vld [vmem:[%s511_s2 + $0x18] sm:$0xff]  ;;  %vm164_vm0 = vcmask 408576  }
   0x4   :  { %v22_v6 = vld [vmem:[%s511_s2 + $0x28] sm:$0xff]  ;;  %v21_v7 = vld [vmem:[%s511_s2 + $0x20] sm:$0xff]  ;;  %v23_v8 = vld [vmem:[%s511_s2 + $0x30] sm:$0x3]  ;;  %v424_v15 = vmov 2   ;;  %v425_v16 = vmov 3  }
   0x5   :  { %v121_v9 = vld [vmem:[%s510_s1] sm:$0xff]  ;;  %v122_v10 = vld [vmem:[%s510_s1 + $0x8] sm:$0xff]  ;;  %v426_v17 = vmov 4   ;;  %vm177_vm1 = vcmask 1040384   ;;  %vm299_vm2 = vcmask 1041408  }
   0x6   :  { %383 = vset.pattern.permute.xlu0 %v423_v4  ;;  %77 = vperm.xlu1 %380, %v18_v3   ;;  %v125_v11 = vld [vmem:[%s510_s1 + $0x20] sm:$0xff]  ;;  %v128_v12 = vpack.c.bf16 %v122_v10, %v121_v9  ;;  %v126_v13 = vld [vmem:[%s510_s1 + $0x28] sm:$0xff] }
   0x7   :  { %26 = vperm.xlu0 %383, %v17_v1   ;;  %v130_v14 = vpack.c.bf16 %v126_v13, %v125_v11  ;;  %v334_v20 = vld [vmem:[%s509_s0] ss:$0 sm:$0xff] }
   0x8   :  { %356 = vmatprep.mubr.msk.bf16.mxu0 %vm164_vm0, %v128_v12 }
   0x9   :  { %360 = vmatprep.mubr.msk.bf16.mxu1 %vm164_vm0, %v130_v14 }
   0xa   :  { %381 = vset.pattern.permute.xlu1 %v423_v4 }
   0xb   :  { %31 = vperm.xlu0 %383, %v18_v3   ;;  %41 = vperm.xlu1 %381, %v20_v5  }
   0xf   :  { %36 = vperm.xlu0 %383, %v19_v0   ;;  %384 = vset.pattern.permute.xlu1 %v422_v2 }
  0x10   :  { %85 = vperm.xlu1 %384, %v20_v5  }
  0x13   :  { %51 = vperm.xlu0 %383, %v22_v6  }
  0x14   :  { %385 = vset.pattern.permute.xlu1 %v423_v4 }
  0x15   :  { %46 = vperm.xlu1 %385, %v21_v7  }
  0x17   :  { %56 = vperm.xlu0 %383, %v23_v8  }
  0x19   :  { %386 = vset.pattern.permute.xlu1 %v422_v2  ;;  %v127_v2 = vld [vmem:[%s510_s1 + $0x30] sm:$0x3] }
  0x1a   :  { %89 = vperm.xlu1 %386, %v21_v7  }
  0x1b   :  { %387 = vset.pattern.permute.xlu0 %v424_v15 }
  0x1c   :  { %137 = vperm.xlu0 %387, %v17_v1  }
  0x1e   :  { %93 = vperm.xlu1 %386, %v22_v6  }
  0x20   :  { %149 = vperm.xlu0 %387, %v20_v5  }
  0x22   :  { %97 = vperm.xlu1 %386, %v23_v8  }
  0x24   :  { %389 = vset.pattern.permute.xlu0 %v425_v16 }
  0x25   :  { %260 = vperm.xlu0 %389, %v17_v1  }
  0x26   :  { %388 = vset.pattern.permute.xlu1 %v424_v15 }
  0x27   :  { %141 = vperm.xlu1 %388, %v18_v3  }
  0x29   :  { %268 = vperm.xlu0 %389, %v19_v0  }
  0x2b   :  { %145 = vperm.xlu1 %388, %v19_v0   ;;  %v123_v0 = vld [vmem:[%s510_s1 + $0x10] sm:$0xff] }
  0x2d   :  { %272 = vperm.xlu0 %389, %v20_v5  }
  0x2f   :  { %153 = vperm.xlu1 %388, %v21_v7  }
  0x31   :  { %280 = vperm.xlu0 %389, %v22_v6  }
  0x33   :  { %390 = vset.pattern.permute.xlu1 %v425_v16 }
  0x34   :  { %264 = vperm.xlu1 %390, %v18_v3  }
  0x35   :  { %393 = vset.pattern.permute.xlu0 %v426_v17 }
  0x36   :  { %309 = vperm.xlu0 %393, %v17_v1   ;;  %v124_v1 = vld [vmem:[%s510_s1 + $0x18] sm:$0xff]  ;;  %s427_s1 = smov [#allocation2]  }
  0x37   :  { %v129_v5 = vpack.c.bf16 %v124_v1, %v123_v0  ;;  %s326_s13 = sshll.u32 %s427_s1, 4  ;;  %s327_s13 = int_to_ptr.vmem [resolvable:$true] %s326_s13 }
  0x38   :  { %391 = vset.pattern.permute.xlu1 %v424_v15  ;;  %s398_s14 = scalar_lea.vmem %s327_s13, 16  ;;  %s402_s15 = scalar_lea.vmem %s327_s13, 32 }
  0x39   :  { %157 = vperm.xlu1 %391, %v22_v6   ;;  %v131_v6 = vpack.c.bf16 %v127_v2, %v127_v2  ;;  %p399_p0 = scmp.ne.s32.totalorder %s327_s13, %s398_s14  ;;  %p403_p1 = scmp.lt.s32.totalorder %s327_s13, %s327_s13 }
  0x3a   :  { %p404_p2 = scmp.lt.s32.totalorder %s402_s15, %s398_s14 }
  0x3c   :  { %p405_p3 = por %p404_p2, %p403_p1 }
  0x3d   :  { %161 = vperm.xlu1 %391, %v23_v8  }
  0x3e   :  { %p406_p4 = pnand %p405_p3, %p399_p0 }
  0x41   :  { %392 = vset.pattern.permute.xlu1 %v425_v16 }
  0x42   :  { %276 = vperm.xlu1 %392, %v21_v7  }
  0x46   :  { %284 = vperm.xlu1 %392, %v23_v8  }
  0x81   :  { %v74_v18 = vpop.permute.xlu1 %73  ;;  %v82_v19 = vpop.permute.xlu0 %81 }
  0x85   :  { %v78_v21 = vpop.permute.xlu1 %77 }
  0x86   :  { %v27_v22 = vpop.permute.xlu0 %26 }
  0x87   :  { %v65_v23 = vmul.f32 %v334_v20, %v27_v22 }
  0x89   :  { %v100_v24 = vadd.f32 %v74_v18, %v65_v23 }
  0x8a   :  { %v32_v25 = vpop.permute.xlu0 %31  ;;  %v42_v26 = vpop.permute.xlu1 %41 }
  0x8b   :  { %v66_v27 = vmul.f32 %v334_v20, %v32_v25  ;;  %v107_v28 = vmul.f32 0.01, %v100_v24  ;;  %v68_v30 = vmul.f32 %v334_v20, %v42_v26 }
  0x8d   :  { %v101_v29 = vadd.f32 %v78_v21, %v66_v27  ;;  %v114_v36 = vmax.f32 %v100_v24, %v107_v28 }
  0x8e   :  { %v37_v31 = vpop.permute.xlu0 %36 }
  0x8f   :  { %v108_v32 = vmul.f32 0.01, %v101_v29  ;;  %v67_v33 = vmul.f32 %v334_v20, %v37_v31  ;;  %v86_v34 = vpop.permute.xlu1 %85 }
  0x90   :  { %v103_v35 = vadd.f32 %v86_v34, %v68_v30 }
  0x91   :  { %v115_v37 = vmax.f32 %v101_v29, %v108_v32  ;;  %v102_v38 = vadd.f32 %v82_v19, %v67_v33 }
  0x92   :  { %v110_v39 = vmul.f32 0.01, %v103_v35  ;;  %v52_v46 = vpop.permute.xlu0 %51 }
  0x93   :  { %v132_v40 = vpack.c.bf16 %v115_v37, %v114_v36  ;;  %v109_v41 = vmul.f32 0.01, %v102_v38  ;;  %v70_v50 = vmul.f32 %v334_v20, %v52_v46 }
  0x94   :  { %v117_v42 = vmax.f32 %v103_v35, %v110_v39  ;;  %v47_v43 = vpop.permute.xlu1 %46 }
  0x95   :  { %v116_v44 = vmax.f32 %v102_v38, %v109_v41  ;;  %348 = vmatprep.subr.bf16.mxu0 %v132_v40  ;;  %364 = vmatprep.subr.bf16.mxu1 %v132_v40  ;;  %v69_v47 = vmul.f32 %v334_v20, %v47_v43 }
  0x96   :  { %349 = vmatpush3.bf16.msra.mxu0 %v132_v40  ;;  %368 = vmatpush3.bf16.msra.mxu1 %v132_v40  ;;  %v57_v51 = vpop.permute.xlu0 %56 }
  0x97   :  { %v133_v45 = vpack.c.bf16 %v117_v42, %v116_v44  ;;  %v71_v55 = vmul.f32 %v334_v20, %v57_v51 }
  0x99   :  { %v90_v48 = vpop.permute.xlu1 %89  ;;  %350 = vmatprep.subr.bf16.mxu0 %v133_v45  ;;  %365 = vmatprep.subr.bf16.mxu1 %v133_v45 }
  0x9a   :  { %v104_v49 = vadd.f32 %v90_v48, %v69_v47  ;;  %351 = vmatpush3.bf16.msra.mxu0 %v133_v45  ;;  %369 = vmatpush3.bf16.msra.mxu1 %v133_v45 }
  0x9b   :  { %v138_v10 = vpop.permute.xlu0 %137 }
  0x9c   :  { %v111_v53 = vmul.f32 0.01, %v104_v49 }
  0x9d   :  { %v94_v52 = vpop.permute.xlu1 %93 }
  0x9e   :  { %v105_v54 = vadd.f32 %v94_v52, %v70_v50  ;;  %v118_v58 = vmax.f32 %v104_v49, %v111_v53 }
  0x9f   :  { %v150_v12 = vpop.permute.xlu0 %149 }
  0xa0   :  { %v112_v56 = vmul.f32 0.01, %v105_v54 }
  0xa1   :  { %v98_v57 = vpop.permute.xlu1 %97 }
  0xa2   :  { %v119_v59 = vmax.f32 %v105_v54, %v112_v56  ;;  %v106_v60 = vadd.f32 %v98_v57, %v71_v55 }
  0xa4   :  { %v134_v61 = vpack.c.bf16 %v119_v59, %v118_v58  ;;  %v113_v62 = vmul.f32 0.01, %v106_v60  ;;  %v261_v14 = vpop.permute.xlu0 %260 }
  0xa6   :  { %v120_v63 = vmax.f32 %v106_v60, %v113_v62  ;;  %352 = vmatprep.subr.bf16.mxu0 %v134_v61  ;;  %366 = vmatprep.subr.bf16.mxu1 %v134_v61  ;;  %v142_v7 = vpop.permute.xlu1 %141 }
  0xa7   :  { %353 = vmatpush3.bf16.msra.mxu0 %v134_v61  ;;  %370 = vmatpush3.bf16.msra.mxu1 %v134_v61 }
  0xa8   :  { %v135_v3 = vpack.c.bf16 %v120_v63, %v120_v63  ;;  %v269_v31 = vpop.permute.xlu0 %268 }
  0xaa   :  { %372 = vmatprep.subr.msk.bf16.mxu0 %vm177_vm1, %v135_v3  ;;  %373 = vmatprep.subr.msk.bf16.mxu1 %vm177_vm1, %v135_v3  ;;  %v179_v4 = vsel %vm177_vm1, %v135_v3, 0  ;;  %v146_v8 = vpop.permute.xlu1 %145 }
  0xab   :  { %355 = vmatpush3.bf16.msra.mxu0 %v179_v4  ;;  %371 = vmatpush3.bf16.msra.mxu1 %v179_v4 }
  0xac   :  { %v273_v46 = vpop.permute.xlu0 %272 }
  0xae   :  { %357 = vmatmul.mubr.msk.bf16.vlgmr.msra.gmra.mrb[0].mxu0 %vm164_vm0, %v129_v5  ;;  %361 = vmatmul.mubr.msk.bf16.vlgmr.msra.gmra.mrb[0].mxu1 %vm164_vm0, %v131_v6  ;;  %v154_v9 = vpop.permute.xlu1 %153 }
  0xb0   :  { %v281_v57 = vpop.permute.xlu0 %280 }
  0xb3   :  { %v265_v11 = vpop.permute.xlu1 %264 }
  0xb5   :  { %v310_v5 = vpop.permute.xlu0 %309 }
  0xb8   :  { %v158_v13 = vpop.permute.xlu1 %157 }
  0xbc   :  { %v162_v15 = vpop.permute.xlu1 %161 }
  0xc1   :  { %v277_v40 = vpop.permute.xlu1 %276 }
  0xc5   :  { %v285_v54 = vpop.permute.xlu1 %284 }
 0x181   :  { %v358_v16 = vpop.f32.mrb[0].mxu0  ;;  %v362_v17 = vpop.f32.mrb[0].mxu1 }
 0x182   :  { %v224_v18 = vadd.f32 %v358_v16, %v146_v8  ;;  %v215_v19 = vpop.f32.mrb[1].mxu0  ;;  %v231_v20 = vpop.f32.mrb[1].mxu1  ;;  %v240_v32 = vadd.f32 %v362_v17, %v162_v15 }
 0x183   :  { %v216_v21 = vadd.f32 %v215_v19, %v138_v10  ;;  %v359_v22 = vpop.f32.mrb[2].mxu0  ;;  %v363_v23 = vpop.f32.mrb[2].mxu1  ;;  %v232_v29 = vadd.f32 %v231_v20, %v154_v9 }
 0x184   :  { %v227_v24 = vadd.f32 %v359_v22, %v150_v12  ;;  %v218_v25 = vpop.f32.mrb[3].mxu0  ;;  %v234_v26 = vpop.f32.mrb[3].mxu1  ;;  %v247_v27 = vmul.f32 0.01, %v224_v18  ;;  %v251_v41 = vmul.f32 0.01, %v240_v32 }
 0x185   :  { %v245_v28 = vmul.f32 0.01, %v216_v21  ;;  %v219_v30 = vadd.f32 %v218_v25, %v142_v7  ;;  %v235_v36 = vadd.f32 %v234_v26, %v158_v13  ;;  %v249_v38 = vmul.f32 0.01, %v232_v29 }
 0x186   :  { %v248_v34 = vmul.f32 0.01, %v227_v24  ;;  %v254_v37 = vmax.f32 %v224_v18, %v247_v27  ;;  %v258_v50 = vmax.f32 %v240_v32, %v251_v41 }
 0x187   :  { %v252_v33 = vmax.f32 %v216_v21, %v245_v28  ;;  %v246_v35 = vmul.f32 0.01, %v219_v30  ;;  %v250_v45 = vmul.f32 0.01, %v235_v36  ;;  %v256_v49 = vmax.f32 %v232_v29, %v249_v38 }
 0x188   :  { %v255_v43 = vmax.f32 %v227_v24, %v248_v34  ;;  %v289_v47 = vmul.f32 %v269_v31, %v254_v37  ;;  %v293_v58 = vmul.f32 %v285_v54, %v258_v50 }
 0x189   :  { %v253_v39 = vmax.f32 %v219_v30, %v246_v35  ;;  %v287_v42 = vmul.f32 %v261_v14, %v252_v33  ;;  %v257_v52 = vmax.f32 %v235_v36, %v250_v45  ;;  %v291_v55 = vmul.f32 %v277_v40, %v256_v49 }
 0x18a   :  { %v290_v51 = vmul.f32 %v273_v46, %v255_v43  ;;  %v300_v62 = vsel %vm299_vm2, %v293_v58, 0.0 }
 0x18b   :  { %v288_v44 = vmul.f32 %v265_v11, %v253_v39  ;;  %v292_v59 = vmul.f32 %v281_v57, %v257_v52 }
 0x18d   :  { %v294_v48 = vadd.f32 %v288_v44, %v287_v42 }
 0x18f   :  { %v295_v53 = vadd.f32 %v294_v48, %v289_v47 }
 0x191   :  { %v296_v56 = vadd.f32 %v295_v53, %v290_v51 }
 0x193   :  { %v297_v60 = vadd.f32 %v296_v56, %v291_v55 }
 0x195   :  { %v298_v61 = vadd.f32 %v297_v60, %v292_v59 }
 0x197   :  { %v301_v63 = vadd.f32 %v300_v62, %v298_v61 }
 0x199   :  { %v302_v0 = vrot.slane %v301_v63, 4 }
 0x19b   :  { %v303_v1 = vadd.f32 %v302_v0, %v301_v63 }
 0x19d   :  { %v304_v2 = vrot.slane %v303_v1, 2 }
 0x19f   :  { %v305_v3 = vadd.f32 %v304_v2, %v303_v1 }
 0x1a1   :  { %v306_v4 = vrot.slane %v305_v3, 1 }
 0x1a3   :  { %v307_v6 = vadd.f32 %v306_v4, %v305_v3 }
 0x1a5   :  { %v312_v7 = vadd.f32 %v310_v5, %v307_v6 }
 0x1a7   :  { %v339_v8 = vmul.f32 -1.442695, %v312_v7 }
 0x1a9   :  { %394 = vpow2.f32 %v339_v8 }
 0x1b3   :  { %v395_v9 = vpop.eup %394 }
 0x1b4   :  { %v316_v10 = vadd.f32 1.0, %v395_v9 }
 0x1b6   :  { %396 = vrcp.f32 %v316_v10 }
 0x1c0   :  { %v397_v11 = vpop.eup %396 }
 0x1c1   :  { %319 = vst [vmem:[#allocation2] sm:$0x1] %v397_v11 }
 0x1c2   :  { %409 = shalt.err (!%p406_p4)
}
 0x1c3   :  { %s410_s18 = scalar_lea.hbm %s512_s3, 16 }
 0x1c4   :  { %p411_p5 = scmp.ne.s32.totalorder %s512_s3, %s410_s18  ;;  %p414_p6 = scmp.lt.u32.totalorder %s410_s18, %s512_s3 }
 0x1c6   :  { %p416_p7 = pnand %p414_p6, %p411_p5 }
 0x1c8   :  { %419 = shalt.err (!%p416_p7)
}
 0x1c9   :  { %329 = dma.vmem_to_hbm [thread:$0]  %s327_s13, 16, %s512_s3, [#allocation3]  }
 0x1ca   :  { %420 = dma.done.wait [#allocation3], 16  }
 0x1cb   :  { %421 = vsyncadd [#allocation3], 4294967280 }
 0x1cc   :  { %333 = vsyncpa [#allocation3], 1 }

</bundles_post_ra>
